<compile_context>
chip_gen: v7x
topology: tpu7x:2x2x1
jax: 0.10.0
libtpu: 0.0.40
codegen_flags: <defaults>
</compile_context>

<pallas_src>
import jax
import jax.numpy as jnp
from jax.experimental import pallas as pl
from jax.experimental.pallas import tpu as pltpu


_CLAMP_MIN = 1e-12
_CLAMP_MAX = 1e12  # == 1000000000000.0 in the PyTorch reference


def _center_loss_block_kernel(x_ref, c_ref, out_ref):
    # x_ref:   VMEM (TB, D) feature rows of this block
    # c_ref:   VMEM (TB, D) centers[labels] rows of this block (pre-gathered)
    # out_ref: VMEM (1, 1, 1) per-block partial sum of clipped squared dists
    x = x_ref[...].astype(jnp.float32)
    c = c_ref[...].astype(jnp.float32)
    diff = x - c
    d = jnp.sum(diff * diff, axis=-1, keepdims=True)        # (TB, 1)
    d = jnp.clip(d, _CLAMP_MIN, _CLAMP_MAX)                  # clamp AFTER mask
    out_ref[...] = jnp.sum(d).reshape(1, 1, 1)


def _round_up(n, m):
    return ((n + m - 1) // m) * m


def center_loss(x, centers, labels):
    """x: (B, D) features, centers: (C, D), labels: (B,) int -> scalar f32."""
    B, D = x.shape
    C, _ = centers.shape

    # Gather the single needed center row per sample once in the wrapper
    # (large contiguous DMAs into the kernel; jnp.take clamps OOB labels).
    c_g = jnp.take(centers, labels.astype(jnp.int32), axis=0)    # (B, D)

    # Row-block size: multiple of 8 (sublane rule; last block dim == D, the
    # full array dim, so the lane rule is satisfied for any D).  Cap TB so
    # double-buffered x + gathered-centers blocks stay well inside v7x's
    # 32 MiB scoped-VMEM default: 4 buffers * TB * D * 4 B <= ~24 MiB.
    TB = min(512, _round_up(B, 8))
    while 4 * TB * D * 4 > 24 * 1024 * 1024 and TB > 8:
        TB //= 2
    B_pad = _round_up(B, TB)
    n_blocks = B_pad // TB

    if B_pad != B:
        pad = B_pad - B
        x = jnp.pad(x, ((0, pad), (0, 0)))
        c_g = jnp.pad(c_g, ((0, pad), (0, 0)))
        # Each zero-padded row contributes clip(0) == _CLAMP_MIN; removed below.

    partials = pl.pallas_call(
        _center_loss_block_kernel,
        out_shape=jax.ShapeDtypeStruct((n_blocks, 1, 1), jnp.float32),
        grid_spec=pltpu.PrefetchScalarGridSpec(
            num_scalar_prefetch=0,
            grid=(n_blocks,),
            in_specs=[
                pl.BlockSpec((TB, D), lambda i: (i, 0)),
                pl.BlockSpec((TB, D), lambda i: (i, 0)),
            ],
            out_specs=pl.BlockSpec((1, 1, 1), lambda i: (i, 0, 0)),
        ),
        compiler_params=pltpu.CompilerParams(
            # No cross-step state -> parallel axis (megacore-shardable on v7x).
            dimension_semantics=("parallel",),
        ),
    )(x, c_g)

    # Remove the exact contribution of zero-padded rows, take the batch mean,
    # and add the closed-form contribution of the (C-1) masked-off columns
    # per row, each clamped up to _CLAMP_MIN (PyTorch clamps AFTER masking).
    total = jnp.sum(partials) - jnp.float32(B_pad - B) * jnp.float32(_CLAMP_MIN)
    loss = total / jnp.float32(B) + jnp.float32(C - 1) * jnp.float32(_CLAMP_MIN)
    return loss


def center_loss_ref(x, centers, labels):
    """Pure-JAX reference mirroring the PyTorch forward (full distmat)."""
    B = x.shape[0]
    C = centers.shape[0]
    distmat = (
        jnp.sum(x**2, axis=1, keepdims=True)
        + jnp.sum(centers**2, axis=1, keepdims=True).T
        - 2.0 * x @ centers.T
    )
    mask = (labels[:, None] == jnp.arange(C)[None, :]).astype(jnp.float32)
    dist = jnp.clip(distmat * mask, _CLAMP_MIN, _CLAMP_MAX)
    return jnp.sum(dist) / B


if __name__ == "__main__":
    key = jax.random.PRNGKey(0)
    k_x, k_c, k_l = jax.random.split(key, 3)

    num_classes = 16   # C
    feat_dim = 32      # D
    batch = 8          # B

    # Deterministic "parameter" init (stands in for nn.Parameter(torch.randn(C, D))).
    centers = jax.random.normal(k_c, (num_classes, feat_dim), dtype=jnp.float32)
    x = jax.random.normal(k_x, (batch, feat_dim), dtype=jnp.float32)
    labels = jax.random.randint(k_l, (batch,), 0, num_classes, dtype=jnp.int32)

    loss = center_loss(x, centers, labels)
    jax.block_until_ready(loss)

    ref = center_loss_ref(x, centers, labels)
    assert jnp.allclose(loss, ref, rtol=1e-5, atol=1e-5), (loss, ref)

    print("KERNEL_OK")
</pallas_src>

<mosaic_0001>
module attributes {stable_mosaic.version = 11 : i64} {
  func.func @_center_loss_block_kernel(%arg0: i32, %arg1: memref<8x32xf32, #tpu.memory_space<vmem>>, %arg2: memref<8x32xf32, #tpu.memory_space<vmem>>, %arg3: memref<1x1x1xf32, #tpu.memory_space<vmem>>) attributes {dimension_semantics = [#tpu.dimension_semantics<parallel>], iteration_bounds = array<i64: 1>, scalar_prefetch = 0 : i64, scratch_operands = 0 : i64, tpu.core_type = #tpu.core_type<tc>, window_params = [{transform_indices = @transform_0, window_bounds = array<i64: 8, 32>}, {transform_indices = @transform_1, window_bounds = array<i64: 8, 32>}, {transform_indices = @transform_2, window_bounds = array<i64: 1, 1, 1>}]} {
    %c0 = arith.constant 0 : index
    %c0_0 = arith.constant 0 : index
    %0 = vector.load %arg1[%c0, %c0_0] : memref<8x32xf32, #tpu.memory_space<vmem>>, vector<8x32xf32>
    %c0_1 = arith.constant 0 : index
    %c0_2 = arith.constant 0 : index
    %1 = vector.load %arg2[%c0_1, %c0_2] : memref<8x32xf32, #tpu.memory_space<vmem>>, vector<8x32xf32>
    %2 = arith.subf %0, %1 : vector<8x32xf32>
    %3 = arith.mulf %2, %2 : vector<8x32xf32>
    %cst = arith.constant dense<0.000000e+00> : vector<8xf32>
    %4 = vector.multi_reduction <add>, %3, %cst [1] : vector<8x32xf32> to vector<8xf32>
    %5 = vector.shape_cast %4 : vector<8xf32> to vector<8x1xf32>
    %cst_3 = arith.constant 9.99999996E-13 : f32
    %cst_4 = arith.constant 9.99999995E+11 : f32
    %6 = vector.broadcast %cst_3 : f32 to vector<8x1xf32>
    %7 = arith.maximumf %6, %5 : vector<8x1xf32>
    %8 = vector.broadcast %cst_4 : f32 to vector<8x1xf32>
    %9 = arith.minimumf %8, %7 : vector<8x1xf32>
    %10 = vector.shape_cast %9 : vector<8x1xf32> to vector<1x8x1xf32>
    %cst_5 = arith.constant dense<0.000000e+00> : vector<1xf32>
    %11 = vector.multi_reduction <add>, %10, %cst_5 [1, 2] : vector<1x8x1xf32> to vector<1xf32>
    %12 = vector.shape_cast %11 : vector<1xf32> to vector<1x1x1xf32>
    %13 = vector.extract %12[0, 0, 0] : f32 from vector<1x1x1xf32>
    %14 = vector.broadcast %13 : f32 to vector<1x1x1xf32>
    %c0_6 = arith.constant 0 : index
    %c0_7 = arith.constant 0 : index
    %c0_8 = arith.constant 0 : index
    %15 = vector.load %arg3[%c0_6, %c0_7, %c0_8] : memref<1x1x1xf32, #tpu.memory_space<vmem>>, vector<1x1x1xf32>
    tpu.vector_store %arg3[%c0_6, %c0_7, %c0_8], %14 {strides = array<i32>} : memref<1x1x1xf32, #tpu.memory_space<vmem>>, vector<1x1x1xf32>,
    return
  }
  func.func @transform_0(%arg0: i32) -> (i32, i32) {
    %c0_i32 = arith.constant 0 : i32
    %c0_i32_0 = arith.constant 0 : i32
    return %arg0, %c0_i32 : i32, i32
  }
  func.func @transform_1(%arg0: i32) -> (i32, i32) {
    %c0_i32 = arith.constant 0 : i32
    %c0_i32_0 = arith.constant 0 : i32
    return %arg0, %c0_i32 : i32, i32
  }
  func.func @transform_2(%arg0: i32) -> (i32, i32, i32) {
    %c0_i32 = arith.constant 0 : i32
    %c0_i32_0 = arith.constant 0 : i32
    %c0_i32_1 = arith.constant 0 : i32
    return %arg0, %c0_i32, %c0_i32_0 : i32, i32, i32
  }
}

</mosaic_0001>

<bundles_post_ra>
// kernel: tpu_custom_call.1
= control target key start
LH: loop header
LB: loop body
LE: loop exit
PB: predicated region body
PF: predicated region fallthrough
CT: control target
= control target key end

     0   :  { %7 = vsyncpa [#allocation3], 0  ;;  %s207_s0 = inlined_call_operand.hbm [shape: f32[8,32], index: 0, kind: input, shape index: {}]   ;;  %s208_s1 = inlined_call_operand.hbm [shape: f32[8,32], index: 1, kind: input, shape index: {}]   ;;  %s209_s2 = inlined_call_operand.hbm [shape: f32[1,1,1], index: 2, kind: output, shape index: {}]  }
   0x1   :  { %8 = vsyncpa [#allocation6], 0 }
   0x2   :  { %9 = vsyncpa [#allocation4], 0  ;;  %s153_s9 = smov [#allocation2]   ;;  %s154_s11 = smov [#allocation5]  }
   0x3   :  { %s16_s10 = sshll.u32 %s153_s9, 4  ;;  %s26_s12 = sshll.u32 %s154_s11, 4  ;;  %s17_s10 = int_to_ptr.vmem [resolvable:$true] %s16_s10  ;;  %s27_s12 = int_to_ptr.vmem [resolvable:$true] %s26_s12 }
   0x4   :  { %s81_s15 = scalar_lea.hbm %s207_s0, 128 }
   0x5   :  { %p82_p0 = scmp.ne.s32.totalorder %s207_s0, %s81_s15  ;;  %p85_p1 = scmp.lt.u32.totalorder %s81_s15, %s207_s0 }
   0x7   :  { %p87_p2 = pnand %p85_p1, %p82_p0 }
   0x9   :  { %90 = shalt.err (!%p87_p2)
}
   0xa   :  { %s91_s20 = scalar_lea.vmem %s17_s10, 128  ;;  %p96_p4 = scmp.lt.s32.totalorder %s17_s10, %s17_s10 }
   0xb   :  { %p92_p3 = scmp.ne.s32.totalorder %s17_s10, %s91_s20  ;;  %p97_p5 = scmp.lt.s32.totalorder %s91_s20, %s91_s20 }
   0xd   :  { %p98_p6 = por %p97_p5, %p96_p4 }
   0xf   :  { %p99_p7 = pnand %p98_p6, %p92_p3 }
  0x11   :  { %102 = shalt.err (!%p99_p7)
}
  0x12   :  { %19 = dma.hbm_to_vmem [thread:$0]  %s207_s0, 128, %s17_s10, [#allocation3]  }
  0x13   :  { %s103_s25 = scalar_lea.hbm %s208_s1, 128 }
  0x14   :  { %p104_p8 = scmp.ne.s32.totalorder %s208_s1, %s103_s25  ;;  %p107_p9 = scmp.lt.u32.totalorder %s103_s25, %s208_s1 }
  0x16   :  { %p109_p10 = pnand %p107_p9, %p104_p8 }
  0x18   :  { %112 = shalt.err (!%p109_p10)
}
  0x19   :  { %s113_s30 = scalar_lea.vmem %s27_s12, 128  ;;  %p118_p12 = scmp.lt.s32.totalorder %s27_s12, %s27_s12 }
  0x1a   :  { %p114_p11 = scmp.ne.s32.totalorder %s27_s12, %s113_s30  ;;  %p119_p13 = scmp.lt.s32.totalorder %s113_s30, %s113_s30 }
  0x1c   :  { %p120_p0 = por %p119_p13, %p118_p12 }
  0x1e   :  { %p121_p1 = pnand %p120_p0, %p114_p11 }
  0x20   :  { %124 = shalt.err (!%p121_p1)
}
  0x21   :  { %29 = dma.hbm_to_vmem [thread:$0]  %s208_s1, 128, %s27_s12, [#allocation6]  }
  0x22   :  { %147 = dma.done.wait [#allocation3], 128  }
  0x23   :  { %148 = vsyncadd [#allocation3], 4294967168 }
  0x24   :  { %149 = dma.done.wait [#allocation6], 128  }
  0x25   :  { %150 = vsyncadd [#allocation6], 4294967168  ;;  %v36_v0 = vld [vmem:[#allocation2] sm:$0xff]  ;;  %v37_v1 = vld [vmem:[#allocation5] sm:$0xff]  ;;  %vm40_vm0 = vcmask 261120   ;;  %vm46_vm1 = vcmask 7168  }
  0x26   :  { %v38_v2 = vsub.f32 %v36_v0, %v37_v1  ;;  %s155_s1 = smov [#allocation7]   ;;  %vm58_vm2 = vcmask 0  }
  0x27   :  { %s66_s4 = sshll.u32 %s155_s1, 4  ;;  %s67_s4 = int_to_ptr.vmem [resolvable:$true] %s66_s4 }
  0x28   :  { %v39_v3 = vmul.f32 %v38_v2, %v38_v2  ;;  %s125_s6 = scalar_lea.vmem %s67_s4, 16  ;;  %s129_s7 = scalar_lea.vmem %s67_s4, 32 }
  0x29   :  { %p126_p2 = scmp.ne.s32.totalorder %s67_s4, %s125_s6  ;;  %p130_p3 = scmp.lt.s32.totalorder %s67_s4, %s67_s4 }
  0x2a   :  { %v41_v4 = vsel %vm40_vm0, %v39_v3, 0.0  ;;  %p131_p4 = scmp.lt.s32.totalorder %s129_s7, %s125_s6 }
  0x2b   :  { %42 = vadd.xlane.f32.xlu0 %v41_v4 }
  0x2c   :  { %p132_p5 = por %p131_p4, %p130_p3 }
  0x2e   :  { %p133_p6 = pnand %p132_p5, %p126_p2 }
  0xb8   :  { %v43_v5 = vpop.xlane.xlu0 %42 }
  0xb9   :  { %v44_v6 = vmax.f32 %v43_v5, 1e-12 }
  0xbb   :  { %v45_v7 = vmin.f32 %v44_v6, 1e+12 }
  0xbd   :  { %v47_v8 = vsel %vm46_vm1, %v45_v7, 0.0 }
  0xbe   :  { %48 = vadd.xlane.f32.xlu0 %v47_v8 }
 0x14b   :  { %v49_v9 = vpop.xlane.xlu0 %48 }
 0x14c   :  { %v50_v10 = vrot.slane %v49_v9, 4 }
 0x14e   :  { %v51_v11 = vadd.f32 %v50_v10, %v49_v9 }
 0x150   :  { %v52_v12 = vrot.slane %v51_v11, 2 }
 0x152   :  { %v53_v13 = vadd.f32 %v52_v12, %v51_v11 }
 0x154   :  { %v54_v14 = vrot.slane %v53_v13, 1 }
 0x156   :  { %v55_v15 = vadd.f32 %v54_v14, %v53_v13 }
 0x158   :  { %76 = vpush %v55_v15 }
 0x189   :  { %s77_s5 = spop %76 }
 0x18a   :  { %v57_v16 = vstv %s77_s5 }
 0x18b   :  { %59 = vst.msk [vmem:[#allocation7] sm:$0x1] %vm58_vm2, %v57_v16 }
 0x18c   :  { %136 = shalt.err (!%p133_p6)
}
 0x18d   :  { %s137_s10 = scalar_lea.hbm %s209_s2, 16 }
 0x18e   :  { %p138_p7 = scmp.ne.s32.totalorder %s209_s2, %s137_s10  ;;  %p141_p8 = scmp.lt.u32.totalorder %s137_s10, %s209_s2 }
 0x190   :  { %p143_p9 = pnand %p141_p8, %p138_p7 }
 0x192   :  { %146 = shalt.err (!%p143_p9)
}
 0x193   :  { %69 = dma.vmem_to_hbm [thread:$0]  %s67_s4, 16, %s209_s2, [#allocation4]  }
 0x194   :  { %151 = dma.done.wait [#allocation4], 16  }
 0x195   :  { %152 = vsyncadd [#allocation4], 4294967280 }
 0x196   :  { %73 = vsyncpa [#allocation3], 1 }
 0x197   :  { %74 = vsyncpa [#allocation6], 1 }
 0x198   :  { %75 = vsyncpa [#allocation4], 1 }

</bundles_post_ra>
